<compile_context>
chip_gen: v7x
topology: tpu7x:2x2x1
jax: 0.10.0
libtpu: 0.0.40
codegen_flags: <defaults>
</compile_context>

<pallas_src>
import functools

import jax
import jax.numpy as jnp
from jax.experimental import pallas as pl
from jax.experimental.pallas import tpu as pltpu

LANES = 128
SUBLANES = 8
CHUNK_ROWS = 512  # inner compute chunk: 512*128*4B = 256 KiB per f32 value


@functools.lru_cache(maxsize=None)
def _default_max_tile_rows():
    """Generation-aware DMA tile height (rows of 128 lanes)."""
    try:
        cap = int(getattr(pltpu.get_tpu_info(), "vmem_capacity_bytes", 64 << 20))
    except Exception:
        cap = 64 << 20
    # 128 MiB VMEM parts (v5e/v6e): 16384 rows = 8 MiB/input tile.
    # 64 MiB VMEM parts (v7x) / unknown: 8192 rows = 4 MiB/input tile.
    return 16384 if cap >= (100 << 20) else 8192


def _masked_mse_kernel(x_ref, lbl_ref, sum_ref, cnt_ref, *,
                       rows, tile_rows, chunk_rows, tiles_per_part,
                       needs_row_mask):
    p = pl.program_id(0)  # 2-way "parallel" split (megacore on v7x)
    i = pl.program_id(1)  # sequential row-tile within the part

    @pl.when(i == 0)
    def _():
        sum_ref[...] = jnp.zeros_like(sum_ref)
        cnt_ref[...] = jnp.zeros_like(cnt_ref)

    if needs_row_mask:
        # Valid rows remaining in this *logical* (unclamped) tile. It is <= 0
        # for the duplicated overhang tile created by the unconditional 2-way
        # split (its DMA block index is clamped in the index_map); the mask
        # below zeroes that tile's contribution.
        row_limit = rows - (p * tiles_per_part + i) * tile_rows
    else:
        row_limit = None

    n_chunks = tile_rows // chunk_rows

    def accumulate(r0):
        x = x_ref[pl.ds(r0, chunk_rows), :].astype(jnp.float32)
        lbl = lbl_ref[pl.ds(r0, chunk_rows), :].astype(jnp.float32)

        def plain(ops):
            xx, ll = ops
            ok = xx == xx  # ~isnan(x): a single VPU compare
            return jnp.where(ok, xx - ll, 0.0), ok.astype(jnp.float32)

        if needs_row_mask:
            def masked(ops):
                xx, ll = ops
                row = jax.lax.broadcasted_iota(jnp.int32, (chunk_rows, LANES), 0)
                ok = jnp.logical_and(xx == xx, row < (row_limit - r0))
                return jnp.where(ok, xx - ll, 0.0), ok.astype(jnp.float32)

            # Only the (at most two) boundary tiles of the whole grid take the
            # iota/compare branch; all steady-state chunks stay on `plain`.
            diff, cntf = jax.lax.cond(row_limit < r0 + chunk_rows,
                                      masked, plain, (x, lbl))
        else:
            diff, cntf = plain((x, lbl))

        # VPU-only per-chunk reduction to a single (8,128) vreg; accumulate
        # into the resident output blocks. The cross-lane reduce is deferred
        # to the wrapper.
        sum_ref[...] += (diff * diff).reshape(-1, SUBLANES, LANES).sum(axis=0)[None]
        cnt_ref[...] += cntf.reshape(-1, SUBLANES, LANES).sum(axis=0)[None]

    if n_chunks == 1:
        accumulate(0)
    else:
        @pl.loop(0, n_chunks)
        def _(c):
            accumulate(pl.multiple_of(c * chunk_rows, chunk_rows))


@functools.partial(jax.jit, static_argnames=("max_tile_rows",))
def masked_mse_loss(label, x, *, max_tile_rows=None):
    """mean((x[m] - label[m])**2) with m = ~isnan(x)  (PyTorch LossFunction)."""
    if label.shape != x.shape:
        raise ValueError("label and x must have the same shape")

    xf = x.reshape(-1)
    lf = label.reshape(-1)
    n = xf.shape[0]
    if n == 0:
        return jnp.array(jnp.nan, dtype=jnp.float32)  # torch: mean of empty -> NaN

    # Lane-aligned prefix goes through the kernel; the ragged tail (< 128
    # elements, or everything for tiny inputs) is reduced in plain JAX.  This
    # avoids the full-array jnp.pad copy of the previous version.
    m = (n // LANES) * LANES
    if m // LANES < SUBLANES:  # fewer than 8 full rows: not worth a kernel
        m = 0

    tail_sum = jnp.zeros((), jnp.float32)
    tail_cnt = jnp.zeros((), jnp.float32)
    if m < n:
        tx = xf[m:].astype(jnp.float32)
        tl = lf[m:].astype(jnp.float32)
        tvalid = tx == tx
        tail_sum = jnp.sum(jnp.where(tvalid, (tx - tl) ** 2, 0.0))
        tail_cnt = jnp.sum(tvalid.astype(jnp.float32))
    if m == 0:
        return tail_sum / tail_cnt  # 0/0 -> NaN matches torch's empty selection

    rows = m // LANES
    # TODO(synk): verify in HLO that reshape(-1) of small-trailing-dim NCHW
    # inputs does not lower to a relayout copy; if it does, tile the original
    # N-D shape with full trailing dims instead.
    x2 = (xf[:m] if m < n else xf).reshape(rows, LANES)
    l2 = (lf[:m] if m < n else lf).reshape(rows, LANES)

    if max_tile_rows is None:
        max_tile_rows = _default_max_tile_rows()
    mtr = max(SUBLANES, (max_tile_rows // SUBLANES) * SUBLANES)
    if mtr > CHUNK_ROWS:
        mtr = (mtr // CHUNK_ROWS) * CHUNK_ROWS

    rows8 = (rows // SUBLANES) * SUBLANES  # >= 8 here
    if rows8 <= CHUNK_ROWS:
        tile_rows = min(mtr, rows8)
    else:
        tile_rows = min(mtr, (rows // CHUNK_ROWS) * CHUNK_ROWS)
    chunk_rows = min(CHUNK_ROWS, tile_rows)

    num_tiles = -(-rows // tile_rows)
    # Unconditional 2-way split of the row-tile stream: megacore sharding on
    # v7x, a plain sequential outer loop on 1-TC v5e/v6e.
    n_parts = 2 if num_tiles >= 2 else 1
    tiles_per_part = -(-num_tiles // n_parts)
    needs_row_mask = n_parts * tiles_per_part * tile_rows > rows
    clamp = n_parts * tiles_per_part > num_tiles  # odd tile count -> overhang
    last_block = num_tiles - 1

    def in_map(pp, ii):
        idx = pp * tiles_per_part + ii
        if clamp:
            idx = jnp.minimum(idx, last_block)  # keep the DMA in bounds
        return (idx, 0)

    out_map = lambda pp, ii: (pp, 0, 0)

    kernel = functools.partial(
        _masked_mse_kernel,
        rows=rows, tile_rows=tile_rows, chunk_rows=chunk_rows,
        tiles_per_part=tiles_per_part, needs_row_mask=needs_row_mask)

    # 2 pipeline buffers x 2 inputs x tile, plus headroom for chunk temporaries.
    buf_bytes = 2 * tile_rows * LANES * (x2.dtype.itemsize + l2.dtype.itemsize)
    vmem_limit = int(min(max(buf_bytes + (8 << 20), 16 << 20), 64 << 20))

    sums, cnts = pl.pallas_call(
        kernel,
        out_shape=(
            jax.ShapeDtypeStruct((n_parts, SUBLANES, LANES), jnp.float32),
            jax.ShapeDtypeStruct((n_parts, SUBLANES, LANES), jnp.float32),
        ),
        grid_spec=pltpu.PrefetchScalarGridSpec(
            num_scalar_prefetch=0,
            grid=(n_parts, tiles_per_part),
            in_specs=[
                pl.BlockSpec((tile_rows, LANES), in_map),
                pl.BlockSpec((tile_rows, LANES), in_map),
            ],
            out_specs=[
                pl.BlockSpec((1, SUBLANES, LANES), out_map),
                pl.BlockSpec((1, SUBLANES, LANES), out_map),
            ],
        ),
        compiler_params=pltpu.CompilerParams(
            dimension_semantics=("parallel", "arbitrary"),
            vmem_limit_bytes=vmem_limit,
        ),
    )(x2, l2)

    # One cross-lane reduce + divide, outside the hot loop.
    return (jnp.sum(sums) + tail_sum) / (jnp.sum(cnts) + tail_cnt)


def _ref(label, x):
    mask = ~jnp.isnan(x)
    return jnp.sum(jnp.where(mask, (x - label) ** 2, 0.0)) / jnp.sum(mask)


def _check(key, shape, **kw):
    k1, k2, k3 = jax.random.split(key, 3)
    label = jax.random.normal(k1, shape, dtype=jnp.float32)
    x = jax.random.normal(k2, shape, dtype=jnp.float32)
    x = jnp.where(jax.random.bernoulli(k3, p=0.1, shape=shape), jnp.nan, x)
    got = masked_mse_loss(label, x, **kw)
    jax.block_until_ready(got)
    want = _ref(label, x)
    assert jnp.allclose(got, want, rtol=1e-5, atol=1e-6), (shape, got, want)


if __name__ == "__main__":
    key = jax.random.PRNGKey(0)
    ks = jax.random.split(key, 5)
    _check(ks[0], (2, 4, 16, 16))                  # NCHW example: single-tile path
    _check(ks[1], (3, 5, 7))                       # tiny ragged: all-JAX tail path
    _check(ks[2], (2, 21, 64), max_tile_rows=8)    # odd tile count: clamped split + partial tile
    _check(ks[3], (5, 5, 47))                      # kernel prefix + ragged JAX tail
    _check(ks[4], (17, 64, 128))                   # multi-chunk inner loop + partial tile
    print("KERNEL_OK")
</pallas_src>

<mosaic_0001>
module attributes {stable_mosaic.version = 11 : i64} {
  func.func @_masked_mse_kernel(%arg0: i32, %arg1: i32, %arg2: memref<16x128xf32, #tpu.memory_space<vmem>>, %arg3: memref<16x128xf32, #tpu.memory_space<vmem>>, %arg4: memref<1x8x128xf32, #tpu.memory_space<vmem>>, %arg5: memref<1x8x128xf32, #tpu.memory_space<vmem>>) attributes {dimension_semantics = [#tpu.dimension_semantics<parallel>, #tpu.dimension_semantics<arbitrary>], iteration_bounds = array<i64: 1, 1>, scalar_prefetch = 0 : i64, scratch_operands = 0 : i64, tpu.core_type = #tpu.core_type<tc>, window_params = [{transform_indices = @transform_0, window_bounds = array<i64: 16, 128>}, {transform_indices = @transform_1, window_bounds = array<i64: 16, 128>}, {transform_indices = @transform_2, window_bounds = array<i64: 1, 8, 128>}, {transform_indices = @transform_3, window_bounds = array<i64: 1, 8, 128>}]} {
    %c0_i32 = arith.constant 0 : i32
    %0 = arith.cmpi eq, %arg1, %c0_i32 : i32
    %1 = arith.extui %0 : i1 to i32
    %c0_i32_0 = arith.constant 0 : i32
    %2 = arith.cmpi ne, %1, %c0_i32_0 : i32
    scf.if %2 {
      %cst_18 = arith.constant 0.000000e+00 : f32
      %24 = vector.broadcast %cst_18 : f32 to vector<1x8x128xf32>
      %c0_19 = arith.constant 0 : index
      %c0_20 = arith.constant 0 : index
      %c0_21 = arith.constant 0 : index
      %25 = vector.load %arg4[%c0_19, %c0_20, %c0_21] : memref<1x8x128xf32, #tpu.memory_space<vmem>>, vector<1x8x128xf32>
      tpu.vector_store %arg4[%c0_19, %c0_20, %c0_21], %24 {strides = array<i32>} : memref<1x8x128xf32, #tpu.memory_space<vmem>>, vector<1x8x128xf32>,
      %cst_22 = arith.constant 0.000000e+00 : f32
      %26 = vector.broadcast %cst_22 : f32 to vector<1x8x128xf32>
      %c0_23 = arith.constant 0 : index
      %c0_24 = arith.constant 0 : index
      %c0_25 = arith.constant 0 : index
      %27 = vector.load %arg5[%c0_23, %c0_24, %c0_25] : memref<1x8x128xf32, #tpu.memory_space<vmem>>, vector<1x8x128xf32>
      tpu.vector_store %arg5[%c0_23, %c0_24, %c0_25], %26 {strides = array<i32>} : memref<1x8x128xf32, #tpu.memory_space<vmem>>, vector<1x8x128xf32>,
    } else {
    }
    %c0 = arith.constant 0 : index
    %c0_1 = arith.constant 0 : index
    %3 = vector.load %arg2[%c0, %c0_1] : memref<16x128xf32, #tpu.memory_space<vmem>>, vector<16x128xf32>
    %c0_2 = arith.constant 0 : index
    %c0_3 = arith.constant 0 : index
    %4 = vector.load %arg3[%c0_2, %c0_3] : memref<16x128xf32, #tpu.memory_space<vmem>>, vector<16x128xf32>
    %5 = arith.cmpf oeq, %3, %3 : vector<16x128xf32>
    %6 = arith.subf %3, %4 : vector<16x128xf32>
    %cst = arith.constant 0.000000e+00 : f32
    %7 = vector.broadcast %cst : f32 to vector<16x128xf32>
    %8 = arith.select %5, %6, %7 : vector<16x128xi1>, vector<16x128xf32>
    %9 = arith.extui %5 : vector<16x128xi1> to vector<16x128xi32>
    %10 = arith.sitofp %9 : vector<16x128xi32> to vector<16x128xf32>
    %c0_4 = arith.constant 0 : index
    %c0_5 = arith.constant 0 : index
    %c0_6 = arith.constant 0 : index
    %11 = vector.load %arg4[%c0_4, %c0_5, %c0_6] : memref<1x8x128xf32, #tpu.memory_space<vmem>>, vector<1x8x128xf32>
    %12 = arith.mulf %8, %8 : vector<16x128xf32>
    %13 = vector.shape_cast %12 : vector<16x128xf32> to vector<2x8x128xf32>
    %cst_7 = arith.constant dense<0.000000e+00> : vector<8x128xf32>
    %14 = vector.multi_reduction <add>, %13, %cst_7 [0] : vector<2x8x128xf32> to vector<8x128xf32>
    %15 = vector.shape_cast %14 : vector<8x128xf32> to vector<1x8x128xf32>
    %16 = arith.addf %11, %15 : vector<1x8x128xf32>
    %c0_8 = arith.constant 0 : index
    %c0_9 = arith.constant 0 : index
    %c0_10 = arith.constant 0 : index
    %17 = vector.load %arg4[%c0_8, %c0_9, %c0_10] : memref<1x8x128xf32, #tpu.memory_space<vmem>>, vector<1x8x128xf32>
    tpu.vector_store %arg4[%c0_8, %c0_9, %c0_10], %16 {strides = array<i32>} : memref<1x8x128xf32, #tpu.memory_space<vmem>>, vector<1x8x128xf32>,
    %c0_11 = arith.constant 0 : index
    %c0_12 = arith.constant 0 : index
    %c0_13 = arith.constant 0 : index
    %18 = vector.load %arg5[%c0_11, %c0_12, %c0_13] : memref<1x8x128xf32, #tpu.memory_space<vmem>>, vector<1x8x128xf32>
    %19 = vector.shape_cast %10 : vector<16x128xf32> to vector<2x8x128xf32>
    %cst_14 = arith.constant dense<0.000000e+00> : vector<8x128xf32>
    %20 = vector.multi_reduction <add>, %19, %cst_14 [0] : vector<2x8x128xf32> to vector<8x128xf32>
    %21 = vector.shape_cast %20 : vector<8x128xf32> to vector<1x8x128xf32>
    %22 = arith.addf %18, %21 : vector<1x8x128xf32>
    %c0_15 = arith.constant 0 : index
    %c0_16 = arith.constant 0 : index
    %c0_17 = arith.constant 0 : index
    %23 = vector.load %arg5[%c0_15, %c0_16, %c0_17] : memref<1x8x128xf32, #tpu.memory_space<vmem>>, vector<1x8x128xf32>
    tpu.vector_store %arg5[%c0_15, %c0_16, %c0_17], %22 {strides = array<i32>} : memref<1x8x128xf32, #tpu.memory_space<vmem>>, vector<1x8x128xf32>,
    return
  }
  func.func @transform_0(%arg0: i32, %arg1: i32) -> (i32, i32) {
    %c1_i32 = arith.constant 1 : i32
    %0 = arith.muli %arg0, %c1_i32 : i32
    %1 = arith.addi %0, %arg1 : i32
    %c0_i32 = arith.constant 0 : i32
    %c0_i32_0 = arith.constant 0 : i32
    return %1, %c0_i32 : i32, i32
  }
  func.func @transform_1(%arg0: i32, %arg1: i32) -> (i32, i32) {
    %c1_i32 = arith.constant 1 : i32
    %0 = arith.muli %arg0, %c1_i32 : i32
    %1 = arith.addi %0, %arg1 : i32
    %c0_i32 = arith.constant 0 : i32
    %c0_i32_0 = arith.constant 0 : i32
    return %1, %c0_i32 : i32, i32
  }
  func.func @transform_2(%arg0: i32, %arg1: i32) -> (i32, i32, i32) {
    %c0_i32 = arith.constant 0 : i32
    %c0_i32_0 = arith.constant 0 : i32
    %c0_i32_1 = arith.constant 0 : i32
    return %arg0, %c0_i32, %c0_i32_0 : i32, i32, i32
  }
  func.func @transform_3(%arg0: i32, %arg1: i32) -> (i32, i32, i32) {
    %c0_i32 = arith.constant 0 : i32
    %c0_i32_0 = arith.constant 0 : i32
    %c0_i32_1 = arith.constant 0 : i32
    return %arg0, %c0_i32, %c0_i32_0 : i32, i32, i32
  }
}

</mosaic_0001>

<bundles_post_ra>
// kernel: masked_mse_loss.1
= control target key start
LH: loop header
LB: loop body
LE: loop exit
PB: predicated region body
PF: predicated region fallthrough
CT: control target
= control target key end

     0   :  { %v110_v6 = vmov 0.0   ;;  %s149_s0 = inlined_call_operand.vmem [shape: f32[16,128], index: 0, kind: input, shape index: {}]   ;;  %s150_s1 = inlined_call_operand.vmem [shape: f32[16,128], index: 1, kind: input, shape index: {}]   ;;  %s151_s3 = inlined_call_operand.vmem [shape: f32[1,8,128], index: 3, kind: output, shape index: {1}]   ;;  %s152_s2 = inlined_call_operand.vmem [shape: f32[1,8,128], index: 2, kind: output, shape index: {0}]  }
   0x1   :  { %v63_v0 = vld [vmem:[%s149_s0] sm:$0xff]  ;;  %v64_v1 = vld [vmem:[%s149_s0 + $0x8] sm:$0xff] }
   0x2   :  { %v65_v2 = vld [vmem:[%s150_s1] sm:$0xff]  ;;  %v66_v3 = vld [vmem:[%s150_s1 + $0x8] sm:$0xff]  ;;  %vm67_vm0 = vcmp.eq.f32.partialorder %v63_v0, %v63_v0  ;;  %vm68_vm1 = vcmp.eq.f32.partialorder %v64_v1, %v64_v1 }
   0x3   :  { %v69_v4 = vsub.f32 %v63_v0, %v65_v2  ;;  %v70_v5 = vsub.f32 %v64_v1, %v66_v3  ;;  %v107_v7 = vsel %vm67_vm0, 1.0, %v110_v6  ;;  %v108_v8 = vsel %vm68_vm1, 1.0, %v110_v6 }
   0x4   :  { %v84_v10 = vadd.f32 %v108_v8, %v107_v7 }
   0x5   :  { %v71_v9 = vsel %vm67_vm0, %v69_v4, 0.0  ;;  %v72_v11 = vsel %vm68_vm1, %v70_v5, 0.0 }
   0x6   :  { %v78_v12 = vmul.f32 %v71_v9, %v71_v9  ;;  %v79_v13 = vmul.f32 %v72_v11, %v72_v11  ;;  %86 = vst [vmem:[%s151_s3] sm:$0xff] %v84_v10 }
   0x8   :  { %v80_v14 = vadd.f32 %v79_v13, %v78_v12 }
   0xa   :  { %82 = vst [vmem:[%s152_s2] sm:$0xff] %v80_v14 }

</bundles_post_ra>
